<compile_context>
chip_gen: v7x
topology: tpu7x:2x2x1
jax: 0.10.0
libtpu: 0.0.40
codegen_flags: <defaults>
</compile_context>

<pallas_src>
import functools

import jax
import jax.numpy as jnp
import numpy as np
from jax.experimental import pallas as pl
from jax.experimental.pallas import tpu as pltpu

G_CONST = 6.6743e-11


def _physics_loss_kernel(masses_ref, pred_ref, tgt_ref, *rest, physics_weight,
                         compute_physics, n_bodies):
    out_ref = rest[-1]

    pred = pred_ref[...]                      # [6, B, S]  (component, batch, time)
    tgt = tgt_ref[...]                        # [6, B, S]
    _, B, S = pred.shape
    m0 = masses_ref[0]                        # SMEM scalar

    # ---- MSE loss (mean over all elements) ----
    d = pred - tgt
    mse = jnp.sum(d * d) * (1.0 / (6 * B * S))

    # ---- velocity component planes, each [B, S] (batch sublanes, time lanes) ----
    vx, vy, vz = pred[3], pred[4], pred[5]
    v = (vx, vy, vz)

    # ---- energy / momentum conservation ----
    # TODO(synk): the torch module sums KE over time and then calls var(dim=1) on a
    # 1-D tensor (a runtime error); as before we implement the evident intent:
    # per-timestep KE, unbiased variance over time, mean over batch.  The momentum
    # term matches the torch code exactly.
    ke = (0.5 * m0) * (vx * vx + vy * vy + vz * vz)        # [B, S]
    mom = m0 * (vx + vy + vz)                              # [B, S]
    if S > 1:
        inv_s = 1.0 / S
        inv_bsm1 = 1.0 / (B * (S - 1))
        dke = ke - jnp.sum(ke, axis=1, keepdims=True) * inv_s
        dmom = mom - jnp.sum(mom, axis=1, keepdims=True) * inv_s
        energy = jnp.sum(dke * dke) * inv_bsm1
        momentum = jnp.sum(dmom * dmom) * inv_bsm1
    else:
        # torch unbiased variance of a single sample is NaN; mirror that instead of
        # dividing by zero at trace time.
        energy = jnp.float32(jnp.nan)
        momentum = jnp.float32(jnp.nan)

    # ---- physics loss: finite-difference accel vs gravitational accel, fused ----
    if compute_physics:
        pos_ref = rest[0]                     # [N, 3, S-1, B]  (sublane=time, lane=batch)
        Sm1 = S - 1

        def _add(a, x):
            return x if a is None else a + x

        def _sub(a, x):
            return -x if a is None else a - x

        # Position component planes [S-1, B], loaded once each.
        px = [[pos_ref[n, c] for c in range(3)] for n in range(n_bodies)]

        # Newton's-third-law pair loop: each unordered pair computes the separation,
        # r^2 and a single rsqrt once, feeding both bodies' accumulators.
        # TODO(synk): switch to lax.fori_loop over pairs for n_bodies >~ 12-16.
        acc = [[None, None, None] for _ in range(n_bodies)]
        for i in range(n_bodies):
            pix, piy, piz = px[i]
            for j in range(i + 1, n_bodies):
                rx = px[j][0] - pix
                ry = px[j][1] - piy
                rz = px[j][2] - piz
                r2 = rx * rx + ry * ry + rz * rz            # VPU component adds
                # One EUP rsqrt per pair (was sqrt + reciprocal).  Softening moves
                # from (|r| + 1e-10) to (r^2 + 1e-20) — negligible deviation here.
                inv = jax.lax.rsqrt(r2 + 1e-20)
                inv3 = inv * inv * inv
                s_i = (G_CONST * masses_ref[j]) * inv3      # accel on body i (+r dir)
                s_j = (G_CONST * masses_ref[i]) * inv3      # accel on body j (-r dir)
                acc[i][0] = _add(acc[i][0], s_i * rx)
                acc[i][1] = _add(acc[i][1], s_i * ry)
                acc[i][2] = _add(acc[i][2], s_i * rz)
                acc[j][0] = _sub(acc[j][0], s_j * rx)
                acc[j][1] = _sub(acc[j][1], s_j * ry)
                acc[j][2] = _sub(acc[j][2], s_j * rz)

        # Torch-broadcast-faithful residual (requires B == S-1 == N), per body:
        #   dd[t, a] = pred_acc[batch=t, time=i, comp=c] - grav[a, t, i, c]
        # pred_acc[:, i, c] = v_c[:, i+1] - v_c[:, i] is a [B, 1] column whose sublane
        # index plays the role of t; it lane-broadcasts against the [S-1, B]
        # accumulator plane, so no transpose and no extra input are needed.
        phys = None
        for i in range(n_bodies):
            for c in range(3):
                pa_col = v[c][:, i + 1:i + 2] - v[c][:, i:i + 1]     # [B, 1]
                a_ic = acc[i][c]
                if a_ic is None:                                     # n_bodies == 1
                    a_ic = jnp.zeros((Sm1, B), jnp.float32)
                dd = pa_col - a_ic                                   # [S-1, B]
                phys = _add(phys, dd * dd)
        physics = jnp.sum(phys) * (1.0 / (B * Sm1 * n_bodies * 3))
    else:
        physics = jnp.float32(0.0)

    total = mse + physics_weight * physics + 0.01 * energy + 0.01 * momentum

    # Pack the five scalars into one lane-dense row: lanes 0..4 hold
    # total, mse, physics, energy, momentum.  Single unmasked 128-lane store.
    lane = jax.lax.broadcasted_iota(jnp.int32, (1, 128), 1)
    row = (jnp.where(lane == 0, total, 0.0)
           + jnp.where(lane == 1, mse, 0.0)
           + jnp.where(lane == 2, physics, 0.0)
           + jnp.where(lane == 3, energy, 0.0)
           + jnp.where(lane == 4, momentum, 0.0))
    out_ref[...] = row.astype(jnp.float32)


def physics_constrained_loss(predicted, target, positions, masses, physics_weight=0.1):
    """Returns (total_loss, {'mse', 'physics', 'energy', 'momentum'})."""
    B, S, _ = predicted.shape
    N = positions.shape[2]
    physics_weight = float(physics_weight)
    compute_physics = physics_weight > 0 and S > 1

    if compute_physics and not (B == S - 1 == N):
        raise ValueError(
            "The physics term broadcasts pred_acc [B, S-1, 3] against grav "
            "[B, S-1, N, 3] (as in the original torch module), which requires "
            f"B == S-1 == N; got B={B}, S={S}, n_bodies={N}.")

    masses_arr = jnp.asarray(masses, jnp.float32)            # SMEM input, not baked in

    # Lane-dense layouts: batch -> sublanes, time -> lanes (layout plumbing only).
    pred_t = jnp.transpose(predicted.astype(jnp.float32), (2, 0, 1))        # [6, B, S]
    tgt_t = jnp.transpose(target.astype(jnp.float32), (2, 0, 1))            # [6, B, S]
    inputs = [masses_arr, pred_t, tgt_t]
    in_specs = [pl.BlockSpec(memory_space=pltpu.MemorySpace.SMEM),
                pl.BlockSpec(memory_space=pltpu.MemorySpace.VMEM),
                pl.BlockSpec(memory_space=pltpu.MemorySpace.VMEM)]
    if compute_physics:
        # [N, 3, S-1, B]: sublane = grav time, lane = grav batch.  This layout lets
        # the kernel realize the torch broadcast with a [B, 1] column slice of the
        # in-kernel finite-difference acceleration (no velT input, no transpose).
        pos_t = jnp.transpose(positions[:, :S - 1].astype(jnp.float32), (2, 3, 1, 0))
        inputs.append(pos_t)
        in_specs.append(pl.BlockSpec(memory_space=pltpu.MemorySpace.VMEM))

    kernel = functools.partial(
        _physics_loss_kernel,
        physics_weight=physics_weight,   # structural hyperparameter; kept static
        compute_physics=compute_physics,
        n_bodies=N,
    )

    # Advisory cost estimate so XLA schedules this call sensibly inside larger jits.
    pair_elems = B * max(S - 1, 1)
    flops = 6 * B * S * 3 + B * S * 14
    transcendentals = 0
    if compute_physics:
        n_pairs = N * (N - 1) // 2
        flops += n_pairs * pair_elems * 20 + N * 3 * pair_elems * 4
        transcendentals += n_pairs * pair_elems
    bytes_accessed = sum(int(a.size) * 4 for a in inputs) + 128 * 4

    out = pl.pallas_call(
        kernel,
        out_shape=jax.ShapeDtypeStruct((1, 128), jnp.float32),
        in_specs=in_specs,
        out_specs=pl.BlockSpec(memory_space=pltpu.MemorySpace.VMEM),
        cost_estimate=pl.CostEstimate(
            flops=int(flops),
            transcendentals=int(transcendentals),
            bytes_accessed=int(bytes_accessed)),
    )(*inputs)

    total = out[0, 0]
    components = {
        "mse": out[0, 1],
        "physics": out[0, 2],
        "energy": out[0, 3],
        "momentum": out[0, 4],
    }
    return total, components


def _reference_loss(predicted, target, positions, masses, physics_weight=0.1):
    """Plain-JAX mirror of the module (same energy-loss fix) for a sanity check."""
    masses = jnp.asarray(masses, jnp.float32)
    mse = jnp.mean((predicted - target) ** 2)
    vel = predicted[:, :, 3:]
    N = positions.shape[2]
    acc = jnp.zeros_like(positions)
    for i in range(N):
        for j in range(N):
            if i != j:
                r_vec = positions[:, :, j] - positions[:, :, i]
                r_mag = jnp.linalg.norm(r_vec, axis=-1, keepdims=True) + 1e-10
                acc_mag = G_CONST * masses[j] / r_mag ** 2
                acc = acc.at[:, :, i].add(acc_mag * r_vec / r_mag)
    pred_acc = jnp.diff(vel, axis=1) / 1.0
    min_len = min(pred_acc.shape[1], acc.shape[1])
    physics = jnp.mean((pred_acc[:, :min_len] - acc[:, :min_len]) ** 2)
    ke = 0.5 * masses[0] * jnp.sum(vel ** 2, axis=-1)
    energy = jnp.mean(jnp.var(ke, axis=1, ddof=1))
    mom = jnp.sum(masses[0] * vel, axis=-1)
    momentum = jnp.mean(jnp.var(mom, axis=1, ddof=1))
    total = mse + physics_weight * physics + 0.01 * energy + 0.01 * momentum
    return total, {"mse": mse, "physics": physics, "energy": energy, "momentum": momentum}


if __name__ == "__main__":
    # Shapes chosen so the original module's physics-loss broadcast is well defined:
    # B == S-1 == N.
    B, S, N = 3, 4, 3
    key = jax.random.PRNGKey(0)
    k1, k2, k3 = jax.random.split(key, 3)
    predicted = jax.random.normal(k1, (B, S, 6), dtype=jnp.float32)
    target = jax.random.normal(k2, (B, S, 6), dtype=jnp.float32)
    positions = jax.random.normal(k3, (B, S, N, 3), dtype=jnp.float32)

    masses = [3.0, 2.0, 1.0]          # deterministic module parameters (len == n_bodies)
    physics_weight = 0.1

    total, comps = physics_constrained_loss(predicted, target, positions, masses, physics_weight)
    jax.block_until_ready(total)

    ref_total, ref_comps = _reference_loss(predicted, target, positions, masses, physics_weight)
    np.testing.assert_allclose(np.asarray(total), np.asarray(ref_total), rtol=1e-4, atol=1e-6)
    for k in comps:
        np.testing.assert_allclose(
            np.asarray(comps[k]), np.asarray(ref_comps[k]), rtol=1e-4, atol=1e-6
        )

    print("KERNEL_OK")
</pallas_src>

<mosaic_0001>
module attributes {stable_mosaic.version = 11 : i64} {
  func.func @_physics_loss_kernel(%arg0: memref<3xf32, #tpu.memory_space<smem>>, %arg1: memref<6x3x4xf32, #tpu.memory_space<vmem>>, %arg2: memref<6x3x4xf32, #tpu.memory_space<vmem>>, %arg3: memref<3x3x3x3xf32, #tpu.memory_space<vmem>>, %arg4: memref<1x128xf32, #tpu.memory_space<vmem>>) attributes {dimension_semantics = [], scalar_prefetch = 0 : i64, scratch_operands = 0 : i64, tpu.core_type = #tpu.core_type<tc>} {
    %c0 = arith.constant 0 : index
    %c0_0 = arith.constant 0 : index
    %c0_1 = arith.constant 0 : index
    %0 = vector.load %arg1[%c0, %c0_0, %c0_1] : memref<6x3x4xf32, #tpu.memory_space<vmem>>, vector<6x3x4xf32>
    %c0_2 = arith.constant 0 : index
    %c0_3 = arith.constant 0 : index
    %c0_4 = arith.constant 0 : index
    %1 = vector.load %arg2[%c0_2, %c0_3, %c0_4] : memref<6x3x4xf32, #tpu.memory_space<vmem>>, vector<6x3x4xf32>
    %c0_5 = arith.constant 0 : index
    %2 = memref.load %arg0[%c0_5] : memref<3xf32, #tpu.memory_space<smem>>
    %3 = arith.subf %0, %1 : vector<6x3x4xf32>
    %4 = arith.mulf %3, %3 : vector<6x3x4xf32>
    %5 = vector.shape_cast %4 : vector<6x3x4xf32> to vector<1x6x3x4xf32>
    %cst = arith.constant dense<0.000000e+00> : vector<1xf32>
    %6 = vector.multi_reduction <add>, %5, %cst [1, 2, 3] : vector<1x6x3x4xf32> to vector<1xf32>
    %7 = vector.shape_cast %6 : vector<1xf32> to vector<1x1x1x1xf32>
    %8 = vector.extract %7[0, 0, 0, 0] : f32 from vector<1x1x1x1xf32>
    %cst_6 = arith.constant 0.013888889 : f32
    %9 = arith.mulf %8, %cst_6 : f32
    %10 = vector.extract_strided_slice %0 {offsets = [3, 0, 0], sizes = [1, 3, 4], strides = [1, 1, 1]} : vector<6x3x4xf32> to vector<1x3x4xf32>
    %11 = vector.shape_cast %10 : vector<1x3x4xf32> to vector<3x4xf32>
    %12 = vector.extract_strided_slice %0 {offsets = [4, 0, 0], sizes = [1, 3, 4], strides = [1, 1, 1]} : vector<6x3x4xf32> to vector<1x3x4xf32>
    %13 = vector.shape_cast %12 : vector<1x3x4xf32> to vector<3x4xf32>
    %14 = vector.extract_strided_slice %0 {offsets = [5, 0, 0], sizes = [1, 3, 4], strides = [1, 1, 1]} : vector<6x3x4xf32> to vector<1x3x4xf32>
    %15 = vector.shape_cast %14 : vector<1x3x4xf32> to vector<3x4xf32>
    %cst_7 = arith.constant 5.000000e-01 : f32
    %16 = arith.mulf %cst_7, %2 : f32
    %17 = arith.mulf %11, %11 : vector<3x4xf32>
    %18 = arith.mulf %13, %13 : vector<3x4xf32>
    %19 = arith.addf %17, %18 : vector<3x4xf32>
    %20 = arith.mulf %15, %15 : vector<3x4xf32>
    %21 = arith.addf %19, %20 : vector<3x4xf32>
    %22 = vector.broadcast %16 : f32 to vector<3x4xf32>
    %23 = arith.mulf %22, %21 : vector<3x4xf32>
    %24 = arith.addf %11, %13 : vector<3x4xf32>
    %25 = arith.addf %24, %15 : vector<3x4xf32>
    %26 = vector.broadcast %2 : f32 to vector<3x4xf32>
    %27 = arith.mulf %26, %25 : vector<3x4xf32>
    %cst_8 = arith.constant dense<0.000000e+00> : vector<3xf32>
    %28 = vector.multi_reduction <add>, %23, %cst_8 [1] : vector<3x4xf32> to vector<3xf32>
    %29 = vector.shape_cast %28 : vector<3xf32> to vector<3x1xf32>
    %cst_9 = arith.constant 2.500000e-01 : f32
    %30 = vector.broadcast %cst_9 : f32 to vector<3x1xf32>
    %31 = arith.mulf %29, %30 : vector<3x1xf32>
    %32 = vector.broadcast %31 : vector<3x1xf32> to vector<3x4xf32>
    %33 = arith.subf %23, %32 : vector<3x4xf32>
    %cst_10 = arith.constant dense<0.000000e+00> : vector<3xf32>
    %34 = vector.multi_reduction <add>, %27, %cst_10 [1] : vector<3x4xf32> to vector<3xf32>
    %35 = vector.shape_cast %34 : vector<3xf32> to vector<3x1xf32>
    %cst_11 = arith.constant 2.500000e-01 : f32
    %36 = vector.broadcast %cst_11 : f32 to vector<3x1xf32>
    %37 = arith.mulf %35, %36 : vector<3x1xf32>
    %38 = vector.broadcast %37 : vector<3x1xf32> to vector<3x4xf32>
    %39 = arith.subf %27, %38 : vector<3x4xf32>
    %40 = arith.mulf %33, %33 : vector<3x4xf32>
    %41 = vector.shape_cast %40 : vector<3x4xf32> to vector<1x3x4xf32>
    %cst_12 = arith.constant dense<0.000000e+00> : vector<1xf32>
    %42 = vector.multi_reduction <add>, %41, %cst_12 [1, 2] : vector<1x3x4xf32> to vector<1xf32>
    %43 = vector.shape_cast %42 : vector<1xf32> to vector<1x1x1xf32>
    %44 = vector.extract %43[0, 0, 0] : f32 from vector<1x1x1xf32>
    %cst_13 = arith.constant 0.111111112 : f32
    %45 = arith.mulf %44, %cst_13 : f32
    %46 = arith.mulf %39, %39 : vector<3x4xf32>
    %47 = vector.shape_cast %46 : vector<3x4xf32> to vector<1x3x4xf32>
    %cst_14 = arith.constant dense<0.000000e+00> : vector<1xf32>
    %48 = vector.multi_reduction <add>, %47, %cst_14 [1, 2] : vector<1x3x4xf32> to vector<1xf32>
    %49 = vector.shape_cast %48 : vector<1xf32> to vector<1x1x1xf32>
    %50 = vector.extract %49[0, 0, 0] : f32 from vector<1x1x1xf32>
    %cst_15 = arith.constant 0.111111112 : f32
    %51 = arith.mulf %50, %cst_15 : f32
    %c0_16 = arith.constant 0 : index
    %c0_17 = arith.constant 0 : index
    %c0_18 = arith.constant 0 : index
    %c0_19 = arith.constant 0 : index
    %52 = vector.load %arg3[%c0_16, %c0_17, %c0_18, %c0_19] : memref<3x3x3x3xf32, #tpu.memory_space<vmem>>, vector<1x1x3x3xf32>
    %53 = vector.shape_cast %52 : vector<1x1x3x3xf32> to vector<3x3xf32>
    %c0_20 = arith.constant 0 : index
    %c1 = arith.constant 1 : index
    %c0_21 = arith.constant 0 : index
    %c0_22 = arith.constant 0 : index
    %54 = vector.load %arg3[%c0_20, %c1, %c0_21, %c0_22] : memref<3x3x3x3xf32, #tpu.memory_space<vmem>>, vector<1x1x3x3xf32>
    %55 = vector.shape_cast %54 : vector<1x1x3x3xf32> to vector<3x3xf32>
    %c0_23 = arith.constant 0 : index
    %c2 = arith.constant 2 : index
    %c0_24 = arith.constant 0 : index
    %c0_25 = arith.constant 0 : index
    %56 = vector.load %arg3[%c0_23, %c2, %c0_24, %c0_25] : memref<3x3x3x3xf32, #tpu.memory_space<vmem>>, vector<1x1x3x3xf32>
    %57 = vector.shape_cast %56 : vector<1x1x3x3xf32> to vector<3x3xf32>
    %c1_26 = arith.constant 1 : index
    %c0_27 = arith.constant 0 : index
    %c0_28 = arith.constant 0 : index
    %c0_29 = arith.constant 0 : index
    %58 = vector.load %arg3[%c1_26, %c0_27, %c0_28, %c0_29] : memref<3x3x3x3xf32, #tpu.memory_space<vmem>>, vector<1x1x3x3xf32>
    %59 = vector.shape_cast %58 : vector<1x1x3x3xf32> to vector<3x3xf32>
    %c1_30 = arith.constant 1 : index
    %c1_31 = arith.constant 1 : index
    %c0_32 = arith.constant 0 : index
    %c0_33 = arith.constant 0 : index
    %60 = vector.load %arg3[%c1_30, %c1_31, %c0_32, %c0_33] : memref<3x3x3x3xf32, #tpu.memory_space<vmem>>, vector<1x1x3x3xf32>
    %61 = vector.shape_cast %60 : vector<1x1x3x3xf32> to vector<3x3xf32>
    %c1_34 = arith.constant 1 : index
    %c2_35 = arith.constant 2 : index
    %c0_36 = arith.constant 0 : index
    %c0_37 = arith.constant 0 : index
    %62 = vector.load %arg3[%c1_34, %c2_35, %c0_36, %c0_37] : memref<3x3x3x3xf32, #tpu.memory_space<vmem>>, vector<1x1x3x3xf32>
    %63 = vector.shape_cast %62 : vector<1x1x3x3xf32> to vector<3x3xf32>
    %c2_38 = arith.constant 2 : index
    %c0_39 = arith.constant 0 : index
    %c0_40 = arith.constant 0 : index
    %c0_41 = arith.constant 0 : index
    %64 = vector.load %arg3[%c2_38, %c0_39, %c0_40, %c0_41] : memref<3x3x3x3xf32, #tpu.memory_space<vmem>>, vector<1x1x3x3xf32>
    %65 = vector.shape_cast %64 : vector<1x1x3x3xf32> to vector<3x3xf32>
    %c2_42 = arith.constant 2 : index
    %c1_43 = arith.constant 1 : index
    %c0_44 = arith.constant 0 : index
    %c0_45 = arith.constant 0 : index
    %66 = vector.load %arg3[%c2_42, %c1_43, %c0_44, %c0_45] : memref<3x3x3x3xf32, #tpu.memory_space<vmem>>, vector<1x1x3x3xf32>
    %67 = vector.shape_cast %66 : vector<1x1x3x3xf32> to vector<3x3xf32>
    %c2_46 = arith.constant 2 : index
    %c2_47 = arith.constant 2 : index
    %c0_48 = arith.constant 0 : index
    %c0_49 = arith.constant 0 : index
    %68 = vector.load %arg3[%c2_46, %c2_47, %c0_48, %c0_49] : memref<3x3x3x3xf32, #tpu.memory_space<vmem>>, vector<1x1x3x3xf32>
    %69 = vector.shape_cast %68 : vector<1x1x3x3xf32> to vector<3x3xf32>
    %70 = arith.subf %59, %53 : vector<3x3xf32>
    %71 = arith.subf %61, %55 : vector<3x3xf32>
    %72 = arith.subf %63, %57 : vector<3x3xf32>
    %73 = arith.mulf %70, %70 : vector<3x3xf32>
    %74 = arith.mulf %71, %71 : vector<3x3xf32>
    %75 = arith.addf %73, %74 : vector<3x3xf32>
    %76 = arith.mulf %72, %72 : vector<3x3xf32>
    %77 = arith.addf %75, %76 : vector<3x3xf32>
    %cst_50 = arith.constant 9.99999968E-21 : f32
    %78 = vector.broadcast %cst_50 : f32 to vector<3x3xf32>
    %79 = arith.addf %77, %78 : vector<3x3xf32>
    %80 = math.rsqrt %79 : vector<3x3xf32>
    %81 = arith.mulf %80, %80 : vector<3x3xf32>
    %82 = arith.mulf %81, %80 : vector<3x3xf32>
    %c1_51 = arith.constant 1 : index
    %83 = memref.load %arg0[%c1_51] : memref<3xf32, #tpu.memory_space<smem>>
    %cst_52 = arith.constant 6.674300e-11 : f32
    %84 = arith.mulf %cst_52, %83 : f32
    %85 = vector.broadcast %84 : f32 to vector<3x3xf32>
    %86 = arith.mulf %85, %82 : vector<3x3xf32>
    %c0_53 = arith.constant 0 : index
    %87 = memref.load %arg0[%c0_53] : memref<3xf32, #tpu.memory_space<smem>>
    %cst_54 = arith.constant 6.674300e-11 : f32
    %88 = arith.mulf %cst_54, %87 : f32
    %89 = vector.broadcast %88 : f32 to vector<3x3xf32>
    %90 = arith.mulf %89, %82 : vector<3x3xf32>
    %91 = arith.mulf %86, %70 : vector<3x3xf32>
    %92 = arith.mulf %86, %71 : vector<3x3xf32>
    %93 = arith.mulf %86, %72 : vector<3x3xf32>
    %94 = arith.mulf %90, %70 : vector<3x3xf32>
    %cst_55 = arith.constant 0.000000e+00 : f32
    %95 = vector.broadcast %cst_55 : f32 to vector<3x3xf32>
    %96 = arith.subf %95, %94 : vector<3x3xf32>
    %97 = arith.mulf %90, %71 : vector<3x3xf32>
    %cst_56 = arith.constant 0.000000e+00 : f32
    %98 = vector.broadcast %cst_56 : f32 to vector<3x3xf32>
    %99 = arith.subf %98, %97 : vector<3x3xf32>
    %100 = arith.mulf %90, %72 : vector<3x3xf32>
    %cst_57 = arith.constant 0.000000e+00 : f32
    %101 = vector.broadcast %cst_57 : f32 to vector<3x3xf32>
    %102 = arith.subf %101, %100 : vector<3x3xf32>
    %103 = arith.subf %65, %53 : vector<3x3xf32>
    %104 = arith.subf %67, %55 : vector<3x3xf32>
    %105 = arith.subf %69, %57 : vector<3x3xf32>
    %106 = arith.mulf %103, %103 : vector<3x3xf32>
    %107 = arith.mulf %104, %104 : vector<3x3xf32>
    %108 = arith.addf %106, %107 : vector<3x3xf32>
    %109 = arith.mulf %105, %105 : vector<3x3xf32>
    %110 = arith.addf %108, %109 : vector<3x3xf32>
    %cst_58 = arith.constant 9.99999968E-21 : f32
    %111 = vector.broadcast %cst_58 : f32 to vector<3x3xf32>
    %112 = arith.addf %110, %111 : vector<3x3xf32>
    %113 = math.rsqrt %112 : vector<3x3xf32>
    %114 = arith.mulf %113, %113 : vector<3x3xf32>
    %115 = arith.mulf %114, %113 : vector<3x3xf32>
    %c2_59 = arith.constant 2 : index
    %116 = memref.load %arg0[%c2_59] : memref<3xf32, #tpu.memory_space<smem>>
    %cst_60 = arith.constant 6.674300e-11 : f32
    %117 = arith.mulf %cst_60, %116 : f32
    %118 = vector.broadcast %117 : f32 to vector<3x3xf32>
    %119 = arith.mulf %118, %115 : vector<3x3xf32>
    %c0_61 = arith.constant 0 : index
    %120 = memref.load %arg0[%c0_61] : memref<3xf32, #tpu.memory_space<smem>>
    %cst_62 = arith.constant 6.674300e-11 : f32
    %121 = arith.mulf %cst_62, %120 : f32
    %122 = vector.broadcast %121 : f32 to vector<3x3xf32>
    %123 = arith.mulf %122, %115 : vector<3x3xf32>
    %124 = arith.mulf %119, %103 : vector<3x3xf32>
    %125 = arith.addf %91, %124 : vector<3x3xf32>
    %126 = arith.mulf %119, %104 : vector<3x3xf32>
    %127 = arith.addf %92, %126 : vector<3x3xf32>
    %128 = arith.mulf %119, %105 : vector<3x3xf32>
    %129 = arith.addf %93, %128 : vector<3x3xf32>
    %130 = arith.mulf %123, %103 : vector<3x3xf32>
    %cst_63 = arith.constant 0.000000e+00 : f32
    %131 = vector.broadcast %cst_63 : f32 to vector<3x3xf32>
    %132 = arith.subf %131, %130 : vector<3x3xf32>
    %133 = arith.mulf %123, %104 : vector<3x3xf32>
    %cst_64 = arith.constant 0.000000e+00 : f32
    %134 = vector.broadcast %cst_64 : f32 to vector<3x3xf32>
    %135 = arith.subf %134, %133 : vector<3x3xf32>
    %136 = arith.mulf %123, %105 : vector<3x3xf32>
    %cst_65 = arith.constant 0.000000e+00 : f32
    %137 = vector.broadcast %cst_65 : f32 to vector<3x3xf32>
    %138 = arith.subf %137, %136 : vector<3x3xf32>
    %139 = arith.subf %65, %59 : vector<3x3xf32>
    %140 = arith.subf %67, %61 : vector<3x3xf32>
    %141 = arith.subf %69, %63 : vector<3x3xf32>
    %142 = arith.mulf %139, %139 : vector<3x3xf32>
    %143 = arith.mulf %140, %140 : vector<3x3xf32>
    %144 = arith.addf %142, %143 : vector<3x3xf32>
    %145 = arith.mulf %141, %141 : vector<3x3xf32>
    %146 = arith.addf %144, %145 : vector<3x3xf32>
    %cst_66 = arith.constant 9.99999968E-21 : f32
    %147 = vector.broadcast %cst_66 : f32 to vector<3x3xf32>
    %148 = arith.addf %146, %147 : vector<3x3xf32>
    %149 = math.rsqrt %148 : vector<3x3xf32>
    %150 = arith.mulf %149, %149 : vector<3x3xf32>
    %151 = arith.mulf %150, %149 : vector<3x3xf32>
    %c2_67 = arith.constant 2 : index
    %152 = memref.load %arg0[%c2_67] : memref<3xf32, #tpu.memory_space<smem>>
    %cst_68 = arith.constant 6.674300e-11 : f32
    %153 = arith.mulf %cst_68, %152 : f32
    %154 = vector.broadcast %153 : f32 to vector<3x3xf32>
    %155 = arith.mulf %154, %151 : vector<3x3xf32>
    %c1_69 = arith.constant 1 : index
    %156 = memref.load %arg0[%c1_69] : memref<3xf32, #tpu.memory_space<smem>>
    %cst_70 = arith.constant 6.674300e-11 : f32
    %157 = arith.mulf %cst_70, %156 : f32
    %158 = vector.broadcast %157 : f32 to vector<3x3xf32>
    %159 = arith.mulf %158, %151 : vector<3x3xf32>
    %160 = arith.mulf %155, %139 : vector<3x3xf32>
    %161 = arith.addf %96, %160 : vector<3x3xf32>
    %162 = arith.mulf %155, %140 : vector<3x3xf32>
    %163 = arith.addf %99, %162 : vector<3x3xf32>
    %164 = arith.mulf %155, %141 : vector<3x3xf32>
    %165 = arith.addf %102, %164 : vector<3x3xf32>
    %166 = arith.mulf %159, %139 : vector<3x3xf32>
    %167 = arith.subf %132, %166 : vector<3x3xf32>
    %168 = arith.mulf %159, %140 : vector<3x3xf32>
    %169 = arith.subf %135, %168 : vector<3x3xf32>
    %170 = arith.mulf %159, %141 : vector<3x3xf32>
    %171 = arith.subf %138, %170 : vector<3x3xf32>
    %172 = vector.extract_strided_slice %11 {offsets = [0, 1], sizes = [3, 1], strides = [1, 1]} : vector<3x4xf32> to vector<3x1xf32>
    %173 = vector.extract_strided_slice %11 {offsets = [0, 0], sizes = [3, 1], strides = [1, 1]} : vector<3x4xf32> to vector<3x1xf32>
    %174 = arith.subf %172, %173 : vector<3x1xf32>
    %175 = vector.broadcast %174 : vector<3x1xf32> to vector<3x3xf32>
    %176 = arith.subf %175, %125 : vector<3x3xf32>
    %177 = arith.mulf %176, %176 : vector<3x3xf32>
    %178 = vector.extract_strided_slice %13 {offsets = [0, 1], sizes = [3, 1], strides = [1, 1]} : vector<3x4xf32> to vector<3x1xf32>
    %179 = vector.extract_strided_slice %13 {offsets = [0, 0], sizes = [3, 1], strides = [1, 1]} : vector<3x4xf32> to vector<3x1xf32>
    %180 = arith.subf %178, %179 : vector<3x1xf32>
    %181 = vector.broadcast %180 : vector<3x1xf32> to vector<3x3xf32>
    %182 = arith.subf %181, %127 : vector<3x3xf32>
    %183 = arith.mulf %182, %182 : vector<3x3xf32>
    %184 = arith.addf %177, %183 : vector<3x3xf32>
    %185 = vector.extract_strided_slice %15 {offsets = [0, 1], sizes = [3, 1], strides = [1, 1]} : vector<3x4xf32> to vector<3x1xf32>
    %186 = vector.extract_strided_slice %15 {offsets = [0, 0], sizes = [3, 1], strides = [1, 1]} : vector<3x4xf32> to vector<3x1xf32>
    %187 = arith.subf %185, %186 : vector<3x1xf32>
    %188 = vector.broadcast %187 : vector<3x1xf32> to vector<3x3xf32>
    %189 = arith.subf %188, %129 : vector<3x3xf32>
    %190 = arith.mulf %189, %189 : vector<3x3xf32>
    %191 = arith.addf %184, %190 : vector<3x3xf32>
    %192 = vector.extract_strided_slice %11 {offsets = [0, 2], sizes = [3, 1], strides = [1, 1]} : vector<3x4xf32> to vector<3x1xf32>
    %193 = vector.extract_strided_slice %11 {offsets = [0, 1], sizes = [3, 1], strides = [1, 1]} : vector<3x4xf32> to vector<3x1xf32>
    %194 = arith.subf %192, %193 : vector<3x1xf32>
    %195 = vector.broadcast %194 : vector<3x1xf32> to vector<3x3xf32>
    %196 = arith.subf %195, %161 : vector<3x3xf32>
    %197 = arith.mulf %196, %196 : vector<3x3xf32>
    %198 = arith.addf %191, %197 : vector<3x3xf32>
    %199 = vector.extract_strided_slice %13 {offsets = [0, 2], sizes = [3, 1], strides = [1, 1]} : vector<3x4xf32> to vector<3x1xf32>
    %200 = vector.extract_strided_slice %13 {offsets = [0, 1], sizes = [3, 1], strides = [1, 1]} : vector<3x4xf32> to vector<3x1xf32>
    %201 = arith.subf %199, %200 : vector<3x1xf32>
    %202 = vector.broadcast %201 : vector<3x1xf32> to vector<3x3xf32>
    %203 = arith.subf %202, %163 : vector<3x3xf32>
    %204 = arith.mulf %203, %203 : vector<3x3xf32>
    %205 = arith.addf %198, %204 : vector<3x3xf32>
    %206 = vector.extract_strided_slice %15 {offsets = [0, 2], sizes = [3, 1], strides = [1, 1]} : vector<3x4xf32> to vector<3x1xf32>
    %207 = vector.extract_strided_slice %15 {offsets = [0, 1], sizes = [3, 1], strides = [1, 1]} : vector<3x4xf32> to vector<3x1xf32>
    %208 = arith.subf %206, %207 : vector<3x1xf32>
    %209 = vector.broadcast %208 : vector<3x1xf32> to vector<3x3xf32>
    %210 = arith.subf %209, %165 : vector<3x3xf32>
    %211 = arith.mulf %210, %210 : vector<3x3xf32>
    %212 = arith.addf %205, %211 : vector<3x3xf32>
    %213 = vector.extract_strided_slice %11 {offsets = [0, 3], sizes = [3, 1], strides = [1, 1]} : vector<3x4xf32> to vector<3x1xf32>
    %214 = vector.extract_strided_slice %11 {offsets = [0, 2], sizes = [3, 1], strides = [1, 1]} : vector<3x4xf32> to vector<3x1xf32>
    %215 = arith.subf %213, %214 : vector<3x1xf32>
    %216 = vector.broadcast %215 : vector<3x1xf32> to vector<3x3xf32>
    %217 = arith.subf %216, %167 : vector<3x3xf32>
    %218 = arith.mulf %217, %217 : vector<3x3xf32>
    %219 = arith.addf %212, %218 : vector<3x3xf32>
    %220 = vector.extract_strided_slice %13 {offsets = [0, 3], sizes = [3, 1], strides = [1, 1]} : vector<3x4xf32> to vector<3x1xf32>
    %221 = vector.extract_strided_slice %13 {offsets = [0, 2], sizes = [3, 1], strides = [1, 1]} : vector<3x4xf32> to vector<3x1xf32>
    %222 = arith.subf %220, %221 : vector<3x1xf32>
    %223 = vector.broadcast %222 : vector<3x1xf32> to vector<3x3xf32>
    %224 = arith.subf %223, %169 : vector<3x3xf32>
    %225 = arith.mulf %224, %224 : vector<3x3xf32>
    %226 = arith.addf %219, %225 : vector<3x3xf32>
    %227 = vector.extract_strided_slice %15 {offsets = [0, 3], sizes = [3, 1], strides = [1, 1]} : vector<3x4xf32> to vector<3x1xf32>
    %228 = vector.extract_strided_slice %15 {offsets = [0, 2], sizes = [3, 1], strides = [1, 1]} : vector<3x4xf32> to vector<3x1xf32>
    %229 = arith.subf %227, %228 : vector<3x1xf32>
    %230 = vector.broadcast %229 : vector<3x1xf32> to vector<3x3xf32>
    %231 = arith.subf %230, %171 : vector<3x3xf32>
    %232 = arith.mulf %231, %231 : vector<3x3xf32>
    %233 = arith.addf %226, %232 : vector<3x3xf32>
    %234 = vector.shape_cast %233 : vector<3x3xf32> to vector<1x3x3xf32>
    %cst_71 = arith.constant dense<0.000000e+00> : vector<1xf32>
    %235 = vector.multi_reduction <add>, %234, %cst_71 [1, 2] : vector<1x3x3xf32> to vector<1xf32>
    %236 = vector.shape_cast %235 : vector<1xf32> to vector<1x1x1xf32>
    %237 = vector.extract %236[0, 0, 0] : f32 from vector<1x1x1xf32>
    %cst_72 = arith.constant 0.0123456791 : f32
    %238 = arith.mulf %237, %cst_72 : f32
    %cst_73 = arith.constant 1.000000e-01 : f32
    %239 = arith.mulf %cst_73, %238 : f32
    %240 = arith.addf %9, %239 : f32
    %cst_74 = arith.constant 0.00999999977 : f32
    %241 = arith.mulf %cst_74, %45 : f32
    %242 = arith.addf %240, %241 : f32
    %cst_75 = arith.constant 0.00999999977 : f32
    %243 = arith.mulf %cst_75, %51 : f32
    %244 = arith.addf %242, %243 : f32
    %245 = tpu.iota {dimensions = array<i32: 1>} : vector<1x128xi32>
    %c0_i32 = arith.constant 0 : i32
    %246 = vector.broadcast %c0_i32 : i32 to vector<1x128xi32>
    %247 = arith.cmpi eq, %245, %246 : vector<1x128xi32>
    %cst_76 = arith.constant 0.000000e+00 : f32
    %248 = vector.broadcast %244 : f32 to vector<1x128xf32>
    %249 = vector.broadcast %cst_76 : f32 to vector<1x128xf32>
    %250 = arith.select %247, %248, %249 : vector<1x128xi1>, vector<1x128xf32>
    %c1_i32 = arith.constant 1 : i32
    %251 = vector.broadcast %c1_i32 : i32 to vector<1x128xi32>
    %252 = arith.cmpi eq, %245, %251 : vector<1x128xi32>
    %cst_77 = arith.constant 0.000000e+00 : f32
    %253 = vector.broadcast %9 : f32 to vector<1x128xf32>
    %254 = vector.broadcast %cst_77 : f32 to vector<1x128xf32>
    %255 = arith.select %252, %253, %254 : vector<1x128xi1>, vector<1x128xf32>
    %256 = arith.addf %250, %255 : vector<1x128xf32>
    %c2_i32 = arith.constant 2 : i32
    %257 = vector.broadcast %c2_i32 : i32 to vector<1x128xi32>
    %258 = arith.cmpi eq, %245, %257 : vector<1x128xi32>
    %cst_78 = arith.constant 0.000000e+00 : f32
    %259 = vector.broadcast %238 : f32 to vector<1x128xf32>
    %260 = vector.broadcast %cst_78 : f32 to vector<1x128xf32>
    %261 = arith.select %258, %259, %260 : vector<1x128xi1>, vector<1x128xf32>
    %262 = arith.addf %256, %261 : vector<1x128xf32>
    %c3_i32 = arith.constant 3 : i32
    %263 = vector.broadcast %c3_i32 : i32 to vector<1x128xi32>
    %264 = arith.cmpi eq, %245, %263 : vector<1x128xi32>
    %cst_79 = arith.constant 0.000000e+00 : f32
    %265 = vector.broadcast %45 : f32 to vector<1x128xf32>
    %266 = vector.broadcast %cst_79 : f32 to vector<1x128xf32>
    %267 = arith.select %264, %265, %266 : vector<1x128xi1>, vector<1x128xf32>
    %268 = arith.addf %262, %267 : vector<1x128xf32>
    %c4_i32 = arith.constant 4 : i32
    %269 = vector.broadcast %c4_i32 : i32 to vector<1x128xi32>
    %270 = arith.cmpi eq, %245, %269 : vector<1x128xi32>
    %cst_80 = arith.constant 0.000000e+00 : f32
    %271 = vector.broadcast %51 : f32 to vector<1x128xf32>
    %272 = vector.broadcast %cst_80 : f32 to vector<1x128xf32>
    %273 = arith.select %270, %271, %272 : vector<1x128xi1>, vector<1x128xf32>
    %274 = arith.addf %268, %273 : vector<1x128xf32>
    %c0_81 = arith.constant 0 : index
    %c0_82 = arith.constant 0 : index
    %275 = vector.load %arg4[%c0_81, %c0_82] : memref<1x128xf32, #tpu.memory_space<vmem>>, vector<1x128xf32>
    tpu.vector_store %arg4[%c0_81, %c0_82], %274 {strides = array<i32>} : memref<1x128xf32, #tpu.memory_space<vmem>>, vector<1x128xf32>,
    return
  }
}

</mosaic_0001>

<bundles_post_ra>
// kernel: tpu_custom_call.1
= control target key start
LH: loop header
LB: loop body
LE: loop exit
PB: predicated region body
PF: predicated region fallthrough
CT: control target
= control target key end

     0   :  { %9 = vsyncpa [#allocation4], 0  ;;  %s615_s0 = inlined_call_operand.vmem [shape: f32[3], index: 0, kind: input, shape index: {}]   ;;  %s616_s1 = inlined_call_operand.vmem [shape: f32[6,3,4], index: 1, kind: input, shape index: {}]   ;;  %s617_s2 = inlined_call_operand.vmem [shape: f32[6,3,4], index: 2, kind: input, shape index: {}]   ;;  %s618_s3 = inlined_call_operand.vmem [shape: f32[3,3,3,3], index: 3, kind: input, shape index: {}]   ;;  %s619_s4 = inlined_call_operand.hbm [shape: f32[1,128], index: 4, kind: output, shape index: {}]  }
   0x1   :  { %10 = vsyncpa [#allocation3], 0  ;;  %s17_s17 = sshll.u32 %s615_s0, 4  ;;  %s18_s17 = int_to_ptr.vmem [resolvable:$true] %s17_s17 }
   0x2   :  { %s395_s18 = scalar_lea.vmem %s18_s17, 16  ;;  %p400_p1 = scmp.lt.s32.totalorder %s18_s17, %s18_s17 }
   0x3   :  { %p396_p0 = scmp.ne.s32.totalorder %s18_s17, %s395_s18  ;;  %p401_p2 = scmp.lt.s32.totalorder %s395_s18, %s395_s18 }
   0x5   :  { %p402_p3 = por %p401_p2, %p400_p1 }
   0x7   :  { %p403_p4 = pnand %p402_p3, %p396_p0 }
   0x9   :  { %406 = shalt.err (!%p403_p4)
}
   0xa   :  { %s433_s19 = smov [#allocation2]  }
   0xb   :  { %20 = dma.vmem_to_smem %s18_s17, 16, %s433_s19, [#allocation4]  }
   0xc   :  { %429 = dma.done.wait [#allocation4], 16  }
   0xd   :  { %430 = vsyncadd [#allocation4], 4294967280 }
   0xe   :  { %30 = sfence }
   0xf   :  { %v34_v0 = vld [vmem:[%s616_s1 + $0xc] sm:$0x7]  ;;  %v473_v1 = vld [vmem:[%s616_s1 + $0x14] sm:$0x7]  ;;  %s434_s0 = smov 1   ;;  %v435_v3 = vmov 1  }
  0x10   :  { %225 = vrot.lane.b32.xlu0 %v34_v0, %s434_s0  ;;  %250 = vrot.lane.b32.xlu1 %v473_v1, %s434_s0  ;;  %v35_v2 = vld [vmem:[%s616_s1 + $0x10] sm:$0x7]  ;;  %s479_s26 = sld [smem:[#allocation2]]  ;;  %v79_v4 = vmul.f32 %v34_v0, %v34_v0  ;;  %v82_v8 = vmul.f32 %v473_v1, %v473_v1  ;;  %vm56_vm0 = vcmask 26624   ;;  %v436_v23 = vmov 2   ;;  %s368_s10 = sld [smem:[#allocation2 + $0x2]] }
  0x11   :  { %383 = vset.pattern.permute.xlu1 %v435_v3  ;;  %384 = vset.pattern.permute.xlu0 %v435_v3  ;;  %v80_v5 = vmul.f32 %v35_v2, %v35_v2  ;;  %v86_v6 = vadd.f32 %v35_v2, %v34_v0  ;;  %v437_v24 = vmov 3   ;;  %v31_v25 = vld [vmem:[%s616_s1] sm:$0x7]  ;;  %v32_v26 = vld [vmem:[%s616_s1 + $0x4] sm:$0x7]  ;;  %vm304_vm1 = vcmask 18432  }
  0x12   :  { %v37_v27 = vld [vmem:[%s617_s2] sm:$0x7]  ;;  %v38_v28 = vld [vmem:[%s617_s2 + $0x4] sm:$0x7]  ;;  %v33_v31 = vld [vmem:[%s616_s1 + $0x8] sm:$0x7] }
  0x13   :  { %v81_v7 = vadd.f32 %v80_v5, %v79_v4  ;;  %v87_v9 = vadd.f32 %v86_v6, %v473_v1  ;;  %v44_v29 = vsub.f32 %v31_v25, %v37_v27  ;;  %v45_v30 = vsub.f32 %v32_v26, %v38_v28  ;;  %v39_v32 = vld [vmem:[%s617_s2 + $0x8] sm:$0x7]  ;;  %v40_v36 = vld [vmem:[%s617_s2 + $0xc] sm:$0x7]  ;;  %v41_v41 = vld [vmem:[%s617_s2 + $0x10] sm:$0x7] }
  0x14   :  { %237 = vrot.lane.b32.xlu0 %v35_v2, %s434_s0  ;;  %v46_v33 = vsub.f32 %v33_v31, %v39_v32  ;;  %v47_v37 = vsub.f32 %v34_v0, %v40_v36  ;;  %v48_v43 = vsub.f32 %v35_v2, %v41_v41  ;;  %v42_v46 = vld [vmem:[%s617_s2 + $0x14] sm:$0x7]  ;;  %v124_v3 = vld [vmem:[%s618_s3] sm:$0x7]  ;;  %v359_v4 = vld [vmem:[%s618_s3 + $0x4] sm:$0x7] }
  0x15   :  { %v83_v10 = vadd.f32 %v82_v8, %v81_v7  ;;  %v50_v34 = vmul.f32 %v44_v29, %v44_v29  ;;  %v51_v35 = vmul.f32 %v45_v30, %v45_v30  ;;  %v49_v48 = vsub.f32 %v473_v1, %v42_v46  ;;  %v361_v5 = vld [vmem:[%s618_s3 + $0xc] sm:$0x7]  ;;  %v362_v6 = vld [vmem:[%s618_s3 + $0x10] sm:$0x7]  ;;  %v364_v7 = vld [vmem:[%s618_s3 + $0x18] sm:$0x7] }
  0x16   :  { %s78_s27 = smul.f32 0.5, %s479_s26  ;;  %v88_v11 = vstv %s479_s26  ;;  %v52_v38 = vmul.f32 %v46_v33, %v46_v33  ;;  %v53_v44 = vmul.f32 %v47_v37, %v47_v37  ;;  %v54_v49 = vmul.f32 %v48_v43, %v48_v43  ;;  %v365_v8 = vld [vmem:[%s618_s3 + $0x1c] sm:$0x7]  ;;  %s438_s24 = smov [#allocation5]  }
  0x17   :  { %v486_v13 = vmul.f32 %v88_v11, %v87_v9  ;;  %v57_v39 = vsel %vm56_vm0, %v50_v34, 0.0  ;;  %v58_v40 = vsel %vm56_vm0, %v51_v35, 0.0  ;;  %v55_v52 = vmul.f32 %v49_v48, %v49_v48  ;;  %v360_v11 = vld [vmem:[%s618_s3 + $0x8] sm:$0x7]  ;;  %s182_s12 = smul.f32 6.6743e-11, %s368_s10 }
  0x18   :  { %v84_v12 = vstv %s78_s27  ;;  %v59_v42 = vadd.f32 %v58_v40, %v57_v39  ;;  %v60_v45 = vsel %vm56_vm0, %v52_v38, 0.0  ;;  %v62_v50 = vsel %vm56_vm0, %v53_v44, 0.0  ;;  %s157_s13 = smul.f32 6.6743e-11, %s479_s26  ;;  %s350_s25 = sshll.u32 %s438_s24, 4  ;;  %s351_s25 = int_to_ptr.vmem [resolvable:$true] %s350_s25 }
  0x19   :  { %v488_v14 = vmul.f32 %v84_v12, %v83_v10  ;;  %v95_v15 = vsel %vm56_vm0, %v486_v13, 0.0  ;;  %v64_v53 = vsel %vm56_vm0, %v54_v49, 0.0  ;;  %v66_v55 = vsel %vm56_vm0, %v55_v52, 0.0  ;;  %v363_v12 = vld [vmem:[%s618_s3 + $0x14] sm:$0x7]  ;;  %s407_s27 = scalar_lea.vmem %s351_s25, 16  ;;  %p412_p6 = scmp.lt.s32.totalorder %s351_s25, %s351_s25 }
  0x1a   :  { %v61_v47 = vadd.f32 %v60_v45, %v59_v42  ;;  %v141_v9 = vsub.f32 %v361_v5, %v124_v3  ;;  %v142_v10 = vsub.f32 %v362_v6, %v359_v4  ;;  %v158_v49 = vstv %s157_s13  ;;  %p408_p5 = scmp.ne.s32.totalorder %s351_s25, %s407_s27  ;;  %s411_s28 = scalar_lea.vmem %s351_s25, 32 }
  0x1b   :  { %v90_v16 = vsel %vm56_vm0, %v488_v14, 0.0  ;;  %p413_p7 = scmp.lt.s32.totalorder %s411_s28, %s407_s27 }
  0x1c   :  { %v63_v51 = vadd.f32 %v62_v50, %v61_v47  ;;  %v183_v47 = vstv %s182_s12 }
  0x1d   :  { %p414_p8 = por %p413_p7, %p412_p6 }
  0x1e   :  { %v65_v54 = vadd.f32 %v64_v53, %v63_v51 }
  0x1f   :  { %p415_p9 = pnand %p414_p8, %p408_p5 }
  0x20   :  { %v67_v56 = vadd.f32 %v66_v55, %v65_v54 }
  0x33   :  { %96 = vadd.xlane.f32.xlu0 %v95_v15  ;;  %v366_v15 = vld [vmem:[%s618_s3 + $0x20] sm:$0x7]  ;;  %s367_s3 = sld [smem:[#allocation2 + $0x1]] }
  0x34   :  { %91 = vadd.xlane.f32.xlu1 %v90_v16  ;;  %v564_v16 = vsub.f32 %v363_v12, %v360_v11  ;;  %v580_v28 = vsub.f32 %v366_v15, %v363_v12 }
  0x36   :  { %v147_v25 = vmul.f32 %v564_v16, %v564_v16  ;;  %v204_v34 = vmul.f32 %v580_v28, %v580_v28 }
  0x39   :  { %s154_s11 = smul.f32 6.6743e-11, %s367_s3 }
  0x3b   :  { %v155_v46 = vstv %s154_s11 }
  0x82   :  { %v226_v17 = vpop.permute.xlu0 %225  ;;  %v251_v18 = vpop.permute.xlu1 %250 }
  0x83   :  { %v228_v19 = vsub.f32 %v34_v0, %v226_v17  ;;  %v253_v20 = vsub.f32 %v473_v1, %v251_v18  ;;  %v144_v17 = vmul.f32 %v141_v9, %v141_v9  ;;  %v145_v18 = vmul.f32 %v142_v10, %v142_v10 }
  0x85   :  { %231 = vperm.xlu1 %383, %v228_v19  }
  0x86   :  { %v238_v21 = vpop.permute.xlu0 %237 }
  0x87   :  { %v240_v22 = vsub.f32 %v35_v2, %v238_v21 }
  0x89   :  { %243 = vperm.xlu0 %384, %v240_v22   ;;  %256 = vperm.xlu1 %383, %v253_v20  }
  0x8d   :  { %386 = vset.pattern.permute.xlu0 %v436_v23  ;;  %385 = vset.pattern.permute.xlu1 %v436_v23  ;;  %v574_v23 = vsub.f32 %v365_v8, %v362_v6 }
  0x8e   :  { %270 = vperm.xlu0 %386, %v240_v22   ;;  %263 = vperm.xlu1 %385, %v228_v19  }
  0x8f   :  { %v202_v30 = vmul.f32 %v574_v23, %v574_v23 }
  0x92   :  { %387 = vset.pattern.permute.xlu0 %v437_v24  ;;  %277 = vperm.xlu1 %385, %v253_v20  }
  0x93   :  { %284 = vperm.xlu0 %387, %v228_v19   ;;  %v566_v19 = vsub.f32 %v366_v15, %v360_v11 }
  0x95   :  { %v175_v27 = vmul.f32 %v566_v19, %v566_v19 }
  0x96   :  { %388 = vset.pattern.permute.xlu1 %v437_v24  ;;  %v146_v24 = vadd.f32 %v145_v18, %v144_v17 }
  0x97   :  { %291 = vperm.xlu1 %388, %v240_v22   ;;  %v572_v22 = vsub.f32 %v364_v7, %v361_v5 }
  0x98   :  { %v148_v31 = vadd.f32 %v147_v25, %v146_v24 }
  0x99   :  { %v201_v29 = vmul.f32 %v572_v22, %v572_v22 }
  0x9a   :  { %v149_v35 = vadd.f32 1e-20, %v148_v31 }
  0x9b   :  { %298 = vperm.xlu1 %388, %v253_v20   ;;  %v203_v33 = vadd.f32 %v202_v30, %v201_v29 }
  0x9c   :  { %389 = vrsqrt.f32 %v149_v35 }
  0x9d   :  { %v205_v37 = vadd.f32 %v204_v34, %v203_v33 }
  0x9f   :  { %v206_v38 = vadd.f32 1e-20, %v205_v37 }
  0xa6   :  { %v390_v39 = vpop.eup %389 }
  0xa7   :  { %v151_v41 = vmul.f32 %v390_v39, %v390_v39 }
  0xa9   :  { %v152_v44 = vmul.f32 %v390_v39, %v151_v41 }
  0xab   :  { %v156_v50 = vmul.f32 %v155_v46, %v152_v44  ;;  %v159_v52 = vmul.f32 %v158_v49, %v152_v44 }
  0xad   :  { %v160_v54 = vmul.f32 %v156_v50, %v141_v9 }
  0xbf   :  { %68 = vadd.xlane.f32.xlu1 %v67_v56  ;;  %v161_v56 = vmul.f32 %v156_v50, %v142_v10 }
  0xc0   :  { %v97_v57 = vpop.xlane.xlu0 %96 }
  0xc1   :  { %v92_v58 = vpop.xlane.xlu1 %91  ;;  %v98_v59 = vmul.f32 0.25, %v97_v57 }
  0xc2   :  { %v93_v60 = vmul.f32 0.25, %v92_v58  ;;  %v162_v58 = vmul.f32 %v156_v50, %v564_v16 }
  0xc3   :  { %v99_v61 = vsub.f32 %v486_v13, %v98_v59  ;;  %v557_v13 = vsub.f32 %v364_v7, %v124_v3 }
  0xc4   :  { %v94_v62 = vsub.f32 %v488_v14, %v93_v60  ;;  %v559_v14 = vsub.f32 %v365_v8, %v359_v4  ;;  %v165_v60 = vmul.f32 %v159_v52, %v142_v10  ;;  %v167_v8 = vmul.f32 %v159_v52, %v564_v16 }
  0xc5   :  { %v112_v63 = vmul.f32 %v99_v61, %v99_v61  ;;  %v172_v20 = vmul.f32 %v557_v13, %v557_v13 }
  0xc6   :  { %v100_v0 = vmul.f32 %v94_v62, %v94_v62  ;;  %v173_v21 = vmul.f32 %v559_v14, %v559_v14  ;;  %v163_v62 = vmul.f32 %v159_v52, %v141_v9  ;;  %v166_v4 = vsub.f32 0.0, %v165_v60 }
  0xc7   :  { %v113_v1 = vsel %vm56_vm0, %v112_v63, 0.0  ;;  %v168_v24 = vsub.f32 0.0, %v167_v8 }
  0xc8   :  { %v101_v2 = vsel %vm56_vm0, %v100_v0, 0.0  ;;  %114 = vadd.xlane.f32.xlu1 %v113_v1  ;;  %v174_v26 = vadd.f32 %v173_v21, %v172_v20  ;;  %v164_v6 = vsub.f32 0.0, %v163_v62 }
  0xc9   :  { %102 = vadd.xlane.f32.xlu0 %v101_v2 }
  0xca   :  { %v176_v32 = vadd.f32 %v175_v27, %v174_v26 }
  0xcc   :  { %v177_v36 = vadd.f32 1e-20, %v176_v32 }
  0xce   :  { %391 = vrsqrt.f32 %v177_v36 }
  0xcf   :  { %393 = vrsqrt.f32 %v206_v38 }
  0xd8   :  { %v392_v40 = vpop.eup %391 }
  0xd9   :  { %v179_v42 = vmul.f32 %v392_v40, %v392_v40  ;;  %v394_v43 = vpop.eup %393 }
  0xda   :  { %v208_v48 = vmul.f32 %v394_v43, %v394_v43 }
  0xdb   :  { %v180_v45 = vmul.f32 %v392_v40, %v179_v42 }
  0xdc   :  { %v209_v53 = vmul.f32 %v394_v43, %v208_v48 }
  0xdd   :  { %v184_v51 = vmul.f32 %v183_v47, %v180_v45  ;;  %v185_v63 = vmul.f32 %v180_v45, %v158_v49 }
  0xde   :  { %v210_v61 = vmul.f32 %v209_v53, %v183_v47  ;;  %v211_v12 = vmul.f32 %v209_v53, %v155_v46 }
  0xdf   :  { %v186_v55 = vmul.f32 %v184_v51, %v557_v13  ;;  %v188_v57 = vmul.f32 %v184_v51, %v559_v14  ;;  %v190_v59 = vmul.f32 %v184_v51, %v566_v19  ;;  %v192_v11 = vmul.f32 %v185_v63, %v557_v13 }
  0xe0   :  { %v214_v5 = vmul.f32 %v210_v61, %v574_v23  ;;  %v212_v7 = vmul.f32 %v210_v61, %v572_v22  ;;  %v216_v25 = vmul.f32 %v210_v61, %v580_v28  ;;  %v218_v27 = vmul.f32 %v211_v12, %v572_v22 }
  0xe1   :  { %v187_v0 = vadd.f32 %v186_v55, %v160_v54  ;;  %v189_v2 = vadd.f32 %v188_v57, %v161_v56  ;;  %v191_v3 = vadd.f32 %v190_v59, %v162_v58  ;;  %v193_v26 = vsub.f32 0.0, %v192_v11 }
  0xe2   :  { %v215_v20 = vadd.f32 %v214_v5, %v166_v4  ;;  %v213_v21 = vadd.f32 %v212_v7, %v164_v6  ;;  %v194_v16 = vmul.f32 %v185_v63, %v559_v14  ;;  %v217_v36 = vadd.f32 %v216_v25, %v168_v24 }
  0xe3   :  { %v219_v37 = vsub.f32 %v193_v26, %v218_v27  ;;  %v220_v40 = vmul.f32 %v211_v12, %v574_v23  ;;  %v196_v41 = vmul.f32 %v185_v63, %v566_v19  ;;  %v222_v49 = vmul.f32 %v211_v12, %v580_v28 }
  0xe4   :  { %v195_v39 = vsub.f32 0.0, %v194_v16 }
  0xe5   :  { %v197_v48 = vsub.f32 0.0, %v196_v41 }
  0xe6   :  { %v221_v47 = vsub.f32 %v195_v39, %v220_v40 }
  0xe7   :  { %v223_v23 = vsub.f32 %v197_v48, %v222_v49 }
 0x104   :  { %v232_v1 = vpop.permute.xlu1 %231 }
 0x105   :  { %v234_v15 = vsub.f32 %v232_v1, %v187_v0 }
 0x107   :  { %v235_v29 = vmul.f32 %v234_v15, %v234_v15 }
 0x108   :  { %v244_v10 = vpop.permute.xlu0 %243  ;;  %v257_v17 = vpop.permute.xlu1 %256 }
 0x109   :  { %v246_v9 = vsub.f32 %v244_v10, %v189_v2  ;;  %v259_v18 = vsub.f32 %v257_v17, %v191_v3 }
 0x10b   :  { %v247_v30 = vmul.f32 %v246_v9, %v246_v9  ;;  %v260_v13 = vmul.f32 %v259_v18, %v259_v18 }
 0x10d   :  { %v248_v31 = vadd.f32 %v247_v30, %v235_v29  ;;  %v271_v32 = vpop.permute.xlu0 %270  ;;  %v264_v33 = vpop.permute.xlu1 %263 }
 0x10e   :  { %v273_v34 = vsub.f32 %v271_v32, %v215_v20  ;;  %v266_v35 = vsub.f32 %v264_v33, %v213_v21 }
 0x10f   :  { %v261_v38 = vadd.f32 %v260_v13, %v248_v31  ;;  %v322_v13 = vlaneseq }
 0x110   :  { %v267_v42 = vmul.f32 %v266_v35, %v266_v35  ;;  %v274_v43 = vmul.f32 %v273_v34, %v273_v34 }
 0x111   :  { %v278_v22 = vpop.permute.xlu1 %277  ;;  %v323_v32 = vand.u32 127, %v322_v13 }
 0x112   :  { %v268_v44 = vadd.f32 %v267_v42, %v261_v38  ;;  %v280_v45 = vsub.f32 %v278_v22, %v217_v36  ;;  %v285_v14 = vpop.permute.xlu0 %284 }
 0x113   :  { %v287_v46 = vsub.f32 %v285_v14, %v219_v37  ;;  %vm327_vm2 = vcmp.eq.s32.totalorder %v323_v32, 1  ;;  %vm324_vm3 = vcmp.eq.s32.totalorder %v323_v32, 0  ;;  %vm331_vm4 = vcmp.eq.s32.totalorder %v323_v32, 2 }
 0x114   :  { %v275_v50 = vadd.f32 %v274_v43, %v268_v44  ;;  %v281_v51 = vmul.f32 %v280_v45, %v280_v45  ;;  %vm335_vm5 = vcmp.eq.s32.totalorder %v323_v32, 3  ;;  %vm339_vm6 = vcmp.eq.s32.totalorder %v323_v32, 4 }
 0x115   :  { %v288_v52 = vmul.f32 %v287_v46, %v287_v46 }
 0x116   :  { %v282_v53 = vadd.f32 %v281_v51, %v275_v50  ;;  %v292_v54 = vpop.permute.xlu1 %291 }
 0x117   :  { %v294_v55 = vsub.f32 %v292_v54, %v221_v47 }
 0x118   :  { %v289_v56 = vadd.f32 %v288_v52, %v282_v53 }
 0x119   :  { %v295_v19 = vmul.f32 %v294_v55, %v294_v55 }
 0x11a   :  { %v299_v57 = vpop.permute.xlu1 %298 }
 0x11b   :  { %v301_v58 = vsub.f32 %v299_v57, %v223_v23  ;;  %v296_v59 = vadd.f32 %v295_v19, %v289_v56 }
 0x11d   :  { %v302_v60 = vmul.f32 %v301_v58, %v301_v58 }
 0x11f   :  { %v303_v61 = vadd.f32 %v302_v60, %v296_v59 }
 0x121   :  { %v305_v62 = vsel %vm304_vm1, %v303_v61, 0.0 }
 0x122   :  { %306 = vadd.xlane.f32.xlu1 %v305_v62 }
 0x14c   :  { %v69_v63 = vpop.xlane.xlu1 %68 }
 0x14d   :  { %v70_v0 = vrot.slane %v69_v63, 4 }
 0x14f   :  { %v71_v28 = vadd.f32 %v70_v0, %v69_v63 }
 0x151   :  { %v72_v1 = vrot.slane %v71_v28, 2 }
 0x153   :  { %v73_v2 = vadd.f32 %v72_v1, %v71_v28 }
 0x155   :  { %v115_v3 = vpop.xlane.xlu1 %114  ;;  %v74_v4 = vrot.slane %v73_v2, 1 }
 0x156   :  { %v103_v5 = vpop.xlane.xlu0 %102  ;;  %v116_v6 = vrot.slane %v115_v3, 4 }
 0x157   :  { %v104_v7 = vrot.slane %v103_v5, 4  ;;  %v75_v8 = vadd.f32 %v74_v4, %v73_v2 }
 0x158   :  { %v117_v11 = vadd.f32 %v116_v6, %v115_v3 }
 0x159   :  { %v105_v12 = vadd.f32 %v104_v7, %v103_v5  ;;  %369 = vpush %v75_v8 }
 0x15a   :  { %v118_v15 = vrot.slane %v117_v11, 2 }
 0x15b   :  { %v106_v10 = vrot.slane %v105_v12, 2 }
 0x15c   :  { %v119_v17 = vadd.f32 %v118_v15, %v117_v11 }
 0x15d   :  { %v107_v9 = vadd.f32 %v106_v10, %v105_v12 }
 0x15e   :  { %v120_v18 = vrot.slane %v119_v17, 1 }
 0x15f   :  { %v108_v20 = vrot.slane %v107_v9, 1 }
 0x160   :  { %v121_v21 = vadd.f32 %v120_v18, %v119_v17 }
 0x161   :  { %v109_v24 = vadd.f32 %v108_v20, %v107_v9 }
 0x163   :  { %371 = vpush %v109_v24 }
 0x164   :  { %373 = vpush %v121_v21 }
 0x18a   :  { %s370_s26 = spop %369 }
 0x18b   :  { %s77_s15 = smul.f32 0.013888889, %s370_s26 }
 0x18d   :  { %v328_v33 = vstv %s77_s15 }
 0x18e   :  { %v329_v36 = vsel %vm327_vm2, %v328_v33, 0.0 }
 0x194   :  { %s372_s14 = spop %371 }
 0x195   :  { %s374_s16 = spop %373  ;;  %s111_s17 = smul.f32 0.11111111, %s372_s14 }
 0x196   :  { %s123_s2 = smul.f32 0.11111111, %s374_s16 }
 0x197   :  { %s318_s20 = smul.f32 0.01, %s111_s17  ;;  %v336_v38 = vstv %s111_s17 }
 0x198   :  { %s320_s22 = smul.f32 0.01, %s123_s2  ;;  %v340_v41 = vstv %s123_s2  ;;  %v337_v22 = vsel %vm335_vm5, %v336_v38, 0.0 }
 0x199   :  { %v341_v44 = vsel %vm339_vm6, %v340_v41, 0.0 }
 0x1af   :  { %v307_v25 = vpop.xlane.xlu1 %306 }
 0x1b0   :  { %v308_v26 = vrot.slane %v307_v25, 4 }
 0x1b2   :  { %v309_v27 = vadd.f32 %v308_v26, %v307_v25 }
 0x1b4   :  { %v310_v29 = vrot.slane %v309_v27, 2 }
 0x1b6   :  { %v311_v30 = vadd.f32 %v310_v29, %v309_v27 }
 0x1b8   :  { %v312_v16 = vrot.slane %v311_v30, 1 }
 0x1ba   :  { %v313_v31 = vadd.f32 %v312_v16, %v311_v30 }
 0x1bc   :  { %375 = vpush %v313_v31 }
 0x1ed   :  { %s376_s1 = spop %375 }
 0x1ee   :  { %s315_s18 = smul.f32 0.012345679, %s376_s1 }
 0x1f0   :  { %s316_s19 = smul.f32 0.1, %s315_s18  ;;  %v332_v35 = vstv %s315_s18 }
 0x1f1   :  { %v333_v40 = vsel %vm331_vm4, %v332_v35, 0.0 }
 0x1f2   :  { %s317_s21 = sadd.f32 %s316_s19, %s77_s15 }
 0x1f4   :  { %s319_s23 = sadd.f32 %s318_s20, %s317_s21 }
 0x1f6   :  { %s321_s0 = sadd.f32 %s320_s22, %s319_s23 }
 0x1f8   :  { %v325_v34 = vstv %s321_s0 }
 0x1f9   :  { %v326_v37 = vsel %vm324_vm3, %v325_v34, 0.0 }
 0x1fa   :  { %v330_v39 = vadd.f32 %v329_v36, %v326_v37 }
 0x1fc   :  { %v334_v42 = vadd.f32 %v333_v40, %v330_v39 }
 0x1fe   :  { %v338_v43 = vadd.f32 %v337_v22, %v334_v42 }
 0x200   :  { %v342_v45 = vadd.f32 %v341_v44, %v338_v43 }
 0x202   :  { %343 = vst [vmem:[#allocation5] sm:$0x1] %v342_v45 }
 0x203   :  { %418 = shalt.err (!%p415_p9)
}
 0x204   :  { %s419_s5 = scalar_lea.hbm %s619_s4, 16 }
 0x205   :  { %p420_p10 = scmp.ne.s32.totalorder %s619_s4, %s419_s5  ;;  %p423_p11 = scmp.lt.u32.totalorder %s419_s5, %s619_s4 }
 0x207   :  { %p425_p12 = pnand %p423_p11, %p420_p10 }
 0x209   :  { %428 = shalt.err (!%p425_p12)
}
 0x20a   :  { %353 = dma.vmem_to_hbm [thread:$0]  %s351_s25, 16, %s619_s4, [#allocation3]  }
 0x20b   :  { %431 = dma.done.wait [#allocation3], 16  }
 0x20c   :  { %432 = vsyncadd [#allocation3], 4294967280 }
 0x20d   :  { %357 = vsyncpa [#allocation3], 1 }
 0x20e   :  { %358 = vsyncpa [#allocation4], 1 }

</bundles_post_ra>
